<compile_context>
chip_gen: v6e
topology: v6e:2x2x1
jax: 0.10.0
libtpu: 0.0.40
codegen_flags: <defaults>
</compile_context>

<pallas_src>
import jax
import jax.numpy as jnp
from jax.experimental import pallas as pl
from jax.experimental.pallas import tpu as pltpu


def symlog(x):
    return jnp.sign(x) * jnp.log(1.0 + jnp.abs(x))


# ----------------------------------------------------------------------------
# Pallas kernel: fused ensemble MLP, critic axis packed into lanes
# ----------------------------------------------------------------------------
def _make_kernel(n_groups, gh):
    def kernel(state_ref, act_ref, gbias_ref, w0s_ref, w0a_ref, w1g_ref, b1_ref,
               w2_ref, b2_ref, phi_ref, val_ref):
        s = state_ref[0]                          # (lt, Ds) bf16, shared across gammas
        a = act_ref[0, 0]                         # (lt, Da) bf16, already clipped

        # layer 0: critics packed along lanes; the symlog(gamma) input column and
        # b0 are pre-folded into the per-gamma f32 bias row.
        h = (jnp.dot(s, w0s_ref[...], preferred_element_type=jnp.float32)
             + jnp.dot(a, w0a_ref[...], preferred_element_type=jnp.float32)
             + gbias_ref[0, 0])
        h = jnp.where(h > 0, h, 0.01 * h)         # leaky_relu(0.01) in f32

        # core layer: block-diagonal per ~256-lane critic group keeps critics
        # independent without a dense (C*H, C*H) matmul full of zeros.
        hb = h.astype(jnp.bfloat16)
        parts = [
            jnp.dot(hb[:, gi * gh:(gi + 1) * gh], w1g_ref[gi],
                    preferred_element_type=jnp.float32)
            for gi in range(n_groups)
        ]
        h = parts[0] if n_groups == 1 else jnp.concatenate(parts, axis=-1)
        h = h + b1_ref[0, 0]
        h = jnp.where(h > 0, h, 0.01 * h)

        phi_ref[0, 0] = h.astype(phi_ref.dtype)   # lane-dense (lt, C*H), consumer layout

        # value head: block-diagonal, lane-padded to >=128 output columns so the
        # HBM store stays unmasked; the wrapper slices the real columns.
        val_ref[0, 0] = (jnp.dot(h.astype(jnp.bfloat16), w2_ref[...],
                                 preferred_element_type=jnp.float32)
                         + b2_ref[0, 0]).astype(val_ref.dtype)

    return kernel


# ----------------------------------------------------------------------------
# Generation-aware tiling plan
# ----------------------------------------------------------------------------
def _vmem_plan(B, L, Ds, Da, CH, GH, n_groups, CO_pad, phi_bytes):
    try:
        vmem_cap = int(pltpu.get_tpu_info().vmem_capacity_bytes)
        if vmem_cap < 32 * 1024 * 1024:
            vmem_cap = 64 * 1024 * 1024
    except Exception:
        vmem_cap = 64 * 1024 * 1024                       # conservative (v7x-sized)
    vmem_limit = min((vmem_cap * 3) // 4, 96 * 1024 * 1024)   # 48 MiB v7x, 96 MiB v5e/v6e
    budget = (vmem_limit * 3) // 4                        # headroom for compiler scratch

    # resident weight/bias blocks (conservatively x2 for the pipeline's buffers)
    resident = 2 * (2 * (Ds + Da) * CH                    # W0 (bf16)
                    + 2 * n_groups * GH * GH              # W1 groups (bf16)
                    + 2 * CH * CO_pad                     # W2 (bf16, lane padded)
                    + 4 * (2 * CH + CO_pad))              # gbias + b1 + b2 (f32)

    # per-row bytes: double-buffered I/O tiles + in-kernel intermediates
    # (h in f32, bf16 copy, matmul partials, padded value row).
    row_bytes = (2 * (2 * Ds + 2 * Da + phi_bytes * CH + 4 * CO_pad)
                 + 12 * CH + 4 * CO_pad)

    avail = max(budget - resident, 2 * 1024 * 1024)
    lt = int(avail // row_bytes)
    lt = max(16, min(lt, 2048))
    lt = (lt // 16) * 16                                  # sublane friendly for bf16/f32
    full = ((L + 15) // 16) * 16
    if lt >= full:
        lt = full
    l_pad = ((L + lt - 1) // lt) * lt
    # keep at least 2 parallel grid steps so both v7x TensorCores get work
    if B * (l_pad // lt) < 2 and lt >= 32:
        lt = max(16, ((lt // 2) // 16) * 16)
        l_pad = ((L + lt - 1) // lt) * lt
    return lt, l_pad, int(vmem_limit)


# ----------------------------------------------------------------------------
# pallas_call wrapper
# ----------------------------------------------------------------------------
def fused_ensemble_mlp(state_bf, action_bf, gbias, w0_s, w0_a, w1g, b1_row,
                       w2_bd, b2_row, *, lt, vmem_limit, phi_dtype):
    """state_bf: (B, L_pad, Ds) bf16; action_bf: (B, G, L_pad, Da) bf16 (clipped);
    gbias: (G, 1, CH) f32; w0_s: (Ds, CH); w0_a: (Da, CH); w1g: (ng, GH, GH);
    b1_row: (1, 1, CH); w2_bd: (CH, CO_pad); b2_row: (1, 1, CO_pad).
    Returns (phis (B, G, L_pad, CH), vals (B, G, L_pad, CO_pad))."""
    B, L_pad, Ds = state_bf.shape
    _, G, _, Da = action_bf.shape
    CH = w0_s.shape[-1]
    n_groups, GH, _ = w1g.shape
    CO_pad = w2_bd.shape[-1]
    grid = (B, L_pad // lt, G)          # G innermost: state tile resident across gammas

    kernel = _make_kernel(n_groups, GH)

    in_specs = [
        pl.BlockSpec((1, lt, Ds), lambda b, i, g: (b, i, 0)),         # state (shared over g)
        pl.BlockSpec((1, 1, lt, Da), lambda b, i, g: (b, g, i, 0)),   # clipped action / gamma
        pl.BlockSpec((1, 1, CH), lambda b, i, g: (g, 0, 0)),          # folded gamma col + b0
        pl.BlockSpec((Ds, CH), lambda b, i, g: (0, 0)),               # W0 state part
        pl.BlockSpec((Da, CH), lambda b, i, g: (0, 0)),               # W0 action part
        pl.BlockSpec((n_groups, GH, GH), lambda b, i, g: (0, 0, 0)),  # W1 block-diag groups
        pl.BlockSpec((1, 1, CH), lambda b, i, g: (0, 0, 0)),          # b1
        pl.BlockSpec((CH, CO_pad), lambda b, i, g: (0, 0)),           # W2 block-diag (padded)
        pl.BlockSpec((1, 1, CO_pad), lambda b, i, g: (0, 0, 0)),      # b2 (padded)
    ]
    out_specs = (
        pl.BlockSpec((1, 1, lt, CH), lambda b, i, g: (b, g, i, 0)),      # phis
        pl.BlockSpec((1, 1, lt, CO_pad), lambda b, i, g: (b, g, i, 0)),  # values (lane dense)
    )
    out_shapes = (
        jax.ShapeDtypeStruct((B, G, L_pad, CH), phi_dtype),
        jax.ShapeDtypeStruct((B, G, L_pad, CO_pad), jnp.float32),
    )
    return pl.pallas_call(
        kernel,
        out_shape=out_shapes,
        grid_spec=pltpu.PrefetchScalarGridSpec(
            num_scalar_prefetch=0,
            grid=grid,
            in_specs=in_specs,
            out_specs=out_specs,
        ),
        compiler_params=pltpu.CompilerParams(
            dimension_semantics=("parallel", "parallel", "arbitrary"),
            vmem_limit_bytes=vmem_limit,
        ),
    )(state_bf, action_bf, gbias, w0_s, w0_a, w1g, b1_row, w2_bd, b2_row)


# ----------------------------------------------------------------------------
# NCritics forward (continuous action path), JAX glue around the kernel
# ----------------------------------------------------------------------------
def ncritics_forward(state, action, gammas, params, phi_dtype=jnp.float32):
    """state: (B, L, Ds) f32; action: (B, L, G, Da) f32; gammas: (G,) f32.
    Returns (outputs (B, L, C, G, 1), phis (B*G, L, C, H)) like NCritics.forward."""
    B, L, Ds = state.shape
    _, _, G, Da = action.shape
    assert gammas.shape == (G,)
    w0, b0, w1, b1, w2, b2 = params
    C, Din, H = w0.shape
    Dout = w2.shape[-1]
    assert Din == Ds + 1 + Da
    CH = C * H
    CO = C * Dout
    CO_pad = max(128, -(-CO // 128) * 128)              # lane-dense value store width

    # --- critic-group size for the block-diagonal core layer (~256 lanes/group) ---
    target_lanes = 256
    gs = 1
    for d in range(1, C + 1):
        if C % d == 0 and d * H <= max(H, target_lanes):
            gs = d
    ng = C // gs
    GH = gs * H

    # --- weight repacking (critic axis -> lanes); bf16 MXU operands, f32 biases ---
    w0_packed = jnp.transpose(w0, (1, 0, 2)).reshape(Din, CH)     # column index = c*H + h
    w0_s = w0_packed[:Ds].astype(jnp.bfloat16)                    # (Ds, CH)
    w0_g = w0_packed[Ds]                                          # (CH,) gamma column, f32
    w0_a = w0_packed[Ds + 1:].astype(jnp.bfloat16)                # (Da, CH)

    eye_g = jnp.eye(gs, dtype=jnp.float32)
    w1g = (eye_g[None, :, None, :, None]
           * w1.reshape(ng, gs, H, H)[:, :, :, None, :]).reshape(ng, GH, GH)
    w1g = w1g.astype(jnp.bfloat16)

    eye_c = jnp.eye(C, dtype=jnp.float32)
    w2_bd = (eye_c[:, None, :, None] * w2[:, :, None, :]).reshape(CH, CO)
    w2_bd = jnp.pad(w2_bd, ((0, 0), (0, CO_pad - CO))).astype(jnp.bfloat16)

    b1_row = b1.reshape(1, 1, CH).astype(jnp.float32)
    b2_row = jnp.pad(b2.reshape(CO), (0, CO_pad - CO)).reshape(1, 1, CO_pad)
    b2_row = b2_row.astype(jnp.float32)

    # symlog(gamma) input column and b0 folded into a per-gamma f32 bias row (G,1,CH)
    gcol = symlog(1.0 / jnp.clip(1.0 - gammas, 1e-6, 1.0))
    gbias = (gcol[:, None, None] * w0_g[None, None, :]
             + b0.reshape(CH)[None, None, :]).astype(jnp.float32)

    # --- tiling plan (generation-aware VMEM budget, intermediates included) ---
    phi_bytes = jnp.dtype(phi_dtype).itemsize
    lt, L_pad, vmem_limit = _vmem_plan(B, L, Ds, Da, CH, GH, ng, CO_pad, phi_bytes)

    # --- inputs: clip in f32, pad L to the tile, cast matmul operands to bf16 ---
    clip_a = jnp.clip(action, -0.999, 0.999)
    if L_pad != L:
        state = jnp.pad(state, ((0, 0), (0, L_pad - L), (0, 0)))
        clip_a = jnp.pad(clip_a, ((0, 0), (0, L_pad - L), (0, 0), (0, 0)))
    state_bf = state.astype(jnp.bfloat16)                              # (B, L_pad, Ds)
    action_bf = jnp.transpose(clip_a, (0, 2, 1, 3)).astype(jnp.bfloat16)  # (B, G, L_pad, Da)

    phis4, vals4 = fused_ensemble_mlp(
        state_bf, action_bf, gbias, w0_s, w0_a, w1g, b1_row, w2_bd, b2_row,
        lt=lt, vmem_limit=vmem_limit, phi_dtype=phi_dtype)

    # phis already come out in the consumer layout: (B, G, L, C*H) -> free reshape.
    phis = phis4[:, :, :L, :].reshape(B * G, L, C, H)
    # values are tiny: slice lane padding and put gammas on the -2 axis.
    outputs = (vals4[:, :, :L, :CO].reshape(B, G, L, C, Dout)
               .transpose(0, 2, 3, 1, 4))                               # (B, L, C, G, Dout)
    return outputs, phis


# ----------------------------------------------------------------------------
# pure-JAX reference (optionally emulating bf16 MXU operands for tight checks)
# ----------------------------------------------------------------------------
def reference_forward(state, action, gammas, params, matmul_dtype=jnp.float32):
    B, L, Ds = state.shape
    _, _, G, Da = action.shape
    w0, b0, w1, b1, w2, b2 = params
    C, Din, H = w0.shape

    def mm(x):  # round matmul operands the same way the kernel does
        return x.astype(matmul_dtype).astype(jnp.float32)

    def lrelu(x):
        return jnp.where(x > 0, x, 0.01 * x)

    hi = jax.lax.Precision.HIGHEST
    gcol = symlog(1.0 / jnp.clip(1.0 - gammas, 1e-6, 1.0))            # (G,)
    clip_a = jnp.clip(action, -0.999, 0.999)                          # (B, L, G, Da)
    w0_s, w0_g, w0_a = w0[:, :Ds], w0[:, Ds], w0[:, Ds + 1:]

    hs = jnp.einsum('bld,cdh->blch', mm(state), mm(w0_s), precision=hi)
    ha = jnp.einsum('blgd,cdh->blgch', mm(clip_a), mm(w0_a), precision=hi)
    hg = gcol[:, None, None] * w0_g[None, :, :]                        # (G, C, H) f32
    h = lrelu(hs[:, :, None] + ha + hg[None, None] + b0[:, 0][None, None, None])
    h = lrelu(jnp.einsum('blgch,chk->blgck', mm(h), mm(w1), precision=hi)
              + b1[:, 0][None, None, None])
    out = (jnp.einsum('blgch,cho->blgco', mm(h), mm(w2), precision=hi)
           + b2[:, 0][None, None, None])

    outputs = jnp.transpose(out, (0, 1, 3, 2, 4))                      # (B, L, C, G, Dout)
    phis = jnp.transpose(h, (0, 2, 1, 3, 4)).reshape(B * G, L, C, H)   # ((b g), L, C, H)
    return outputs, phis


# ----------------------------------------------------------------------------
# test harness
# ----------------------------------------------------------------------------
def _init_params(key, C, inp_dim, d_hidden, out_dim):
    ks = jax.random.split(key, 6)

    def init_layer(kw, kb, din, dout):
        scale = 1.0 / jnp.sqrt(din)
        w = jax.random.uniform(kw, (C, din, dout), jnp.float32, -scale, scale)
        b = jax.random.uniform(kb, (C, 1, dout), jnp.float32, -scale, scale)
        return w, b

    w0, b0 = init_layer(ks[0], ks[1], inp_dim, d_hidden)
    w1, b1 = init_layer(ks[2], ks[3], d_hidden, d_hidden)   # n_layers - 1 = 1 core layer
    w2, b2 = init_layer(ks[4], ks[5], d_hidden, out_dim)
    return (w0, b0, w1, b1, w2, b2)


def _run_and_check(key, *, B, L, state_dim, action_dim, num_critics, d_hidden, gammas):
    G = gammas.shape[0]
    inp_dim = state_dim + action_dim + 1   # continuous path
    k1, k2, k3 = jax.random.split(key, 3)
    state = jax.random.normal(k1, (B, L, state_dim), dtype=jnp.float32)
    action = jnp.tanh(jax.random.normal(k2, (B, L, G, action_dim), dtype=jnp.float32))
    params = _init_params(k3, num_critics, inp_dim, d_hidden, 1)

    outputs, phis = ncritics_forward(state, action, gammas, params)
    jax.block_until_ready((outputs, phis))

    assert outputs.shape == (B, L, num_critics, G, 1)
    assert phis.shape == (B * G, L, num_critics, d_hidden)

    # tight check vs a reference that emulates the kernel's bf16 MXU operands
    ref_out_bf, ref_phi_bf = reference_forward(state, action, gammas, params,
                                               matmul_dtype=jnp.bfloat16)
    assert jnp.allclose(outputs, ref_out_bf, atol=2e-3, rtol=2e-3), \
        float(jnp.max(jnp.abs(outputs - ref_out_bf)))
    assert jnp.allclose(phis, ref_phi_bf, atol=2e-3, rtol=2e-3), \
        float(jnp.max(jnp.abs(phis - ref_phi_bf)))

    # loose check vs full-f32 module semantics (bf16 rounding is ~1e-3 here)
    ref_out, ref_phi = reference_forward(state, action, gammas, params)
    assert jnp.allclose(outputs, ref_out, atol=5e-2, rtol=5e-2)
    assert jnp.allclose(phis, ref_phi, atol=5e-2, rtol=5e-2)


if __name__ == "__main__":
    key = jax.random.PRNGKey(0)
    k_a, k_b = jax.random.split(key)

    # config 1: small (exercises the single critic-group / no-padding path)
    _run_and_check(k_a, B=2, L=8, state_dim=13, action_dim=6,
                   num_critics=4, d_hidden=32,
                   gammas=jnp.array([0.9, 0.99], dtype=jnp.float32))

    # config 2: module-default hidden size (exercises chunked block-diagonal
    # core layer with C*H = 1024, odd L padding, and the lane-padded value head)
    _run_and_check(k_b, B=2, L=5, state_dim=13, action_dim=6,
                   num_critics=4, d_hidden=256,
                   gammas=jnp.array([0.7, 0.9, 0.99], dtype=jnp.float32))

    print("KERNEL_OK")
</pallas_src>

<mosaic_0001>
module attributes {stable_mosaic.version = 11 : i64} {
  func.func @kernel(%arg0: i32, %arg1: i32, %arg2: i32, %arg3: memref<1x16x13xbf16, #tpu.memory_space<vmem>>, %arg4: memref<1x1x16x6xbf16, #tpu.memory_space<vmem>>, %arg5: memref<1x1x128xf32, #tpu.memory_space<vmem>>, %arg6: memref<13x128xbf16, #tpu.memory_space<vmem>>, %arg7: memref<6x128xbf16, #tpu.memory_space<vmem>>, %arg8: memref<1x128x128xbf16, #tpu.memory_space<vmem>>, %arg9: memref<1x1x128xf32, #tpu.memory_space<vmem>>, %arg10: memref<128x128xbf16, #tpu.memory_space<vmem>>, %arg11: memref<1x1x128xf32, #tpu.memory_space<vmem>>, %arg12: memref<1x1x16x128xf32, #tpu.memory_space<vmem>>, %arg13: memref<1x1x16x128xf32, #tpu.memory_space<vmem>>) attributes {dimension_semantics = [#tpu.dimension_semantics<parallel>, #tpu.dimension_semantics<parallel>, #tpu.dimension_semantics<arbitrary>], iteration_bounds = array<i64: 2, 1, 2>, scalar_prefetch = 0 : i64, scratch_operands = 0 : i64, tpu.core_type = #tpu.core_type<tc>, window_params = [{transform_indices = @transform_0, window_bounds = array<i64: 1, 16, 13>}, {transform_indices = @transform_1, window_bounds = array<i64: 1, 1, 16, 6>}, {transform_indices = @transform_2, window_bounds = array<i64: 1, 1, 128>}, {pipeline_mode = #tpu.pipeline_mode<synchronous>, transform_indices = @transform_3, window_bounds = array<i64: 13, 128>}, {pipeline_mode = #tpu.pipeline_mode<synchronous>, transform_indices = @transform_4, window_bounds = array<i64: 6, 128>}, {pipeline_mode = #tpu.pipeline_mode<synchronous>, transform_indices = @transform_5, window_bounds = array<i64: 1, 128, 128>}, {pipeline_mode = #tpu.pipeline_mode<synchronous>, transform_indices = @transform_6, window_bounds = array<i64: 1, 1, 128>}, {pipeline_mode = #tpu.pipeline_mode<synchronous>, transform_indices = @transform_7, window_bounds = array<i64: 128, 128>}, {pipeline_mode = #tpu.pipeline_mode<synchronous>, transform_indices = @transform_8, window_bounds = array<i64: 1, 1, 128>}, {transform_indices = @transform_9, window_bounds = array<i64: 1, 1, 16, 128>}, {transform_indices = @transform_10, window_bounds = array<i64: 1, 1, 16, 128>}]} {
    %c0 = arith.constant 0 : index
    %c0_0 = arith.constant 0 : index
    %c0_1 = arith.constant 0 : index
    %0 = vector.load %arg3[%c0, %c0_0, %c0_1] : memref<1x16x13xbf16, #tpu.memory_space<vmem>>, vector<1x16x13xbf16>
    %1 = vector.shape_cast %0 : vector<1x16x13xbf16> to vector<16x13xbf16>
    %c0_2 = arith.constant 0 : index
    %c0_3 = arith.constant 0 : index
    %c0_4 = arith.constant 0 : index
    %c0_5 = arith.constant 0 : index
    %2 = vector.load %arg4[%c0_2, %c0_3, %c0_4, %c0_5] : memref<1x1x16x6xbf16, #tpu.memory_space<vmem>>, vector<1x1x16x6xbf16>
    %3 = vector.shape_cast %2 : vector<1x1x16x6xbf16> to vector<16x6xbf16>
    %c0_6 = arith.constant 0 : index
    %c0_7 = arith.constant 0 : index
    %4 = vector.load %arg6[%c0_6, %c0_7] : memref<13x128xbf16, #tpu.memory_space<vmem>>, vector<13x128xbf16>
    %cst = arith.constant dense<0.000000e+00> : vector<16x128xf32>
    %5 = tpu.matmul %1, %4, %cst {dimension_numbers = #tpu.dot_dimension_numbers<[1], [0], [0], [1], [0, 0, 1, 1], [], []>} : vector<16x13xbf16>, vector<13x128xbf16>, vector<16x128xf32> -> vector<16x128xf32>
    %c0_8 = arith.constant 0 : index
    %c0_9 = arith.constant 0 : index
    %6 = vector.load %arg7[%c0_8, %c0_9] : memref<6x128xbf16, #tpu.memory_space<vmem>>, vector<6x128xbf16>
    %cst_10 = arith.constant dense<0.000000e+00> : vector<16x128xf32>
    %7 = tpu.matmul %3, %6, %cst_10 {dimension_numbers = #tpu.dot_dimension_numbers<[1], [0], [0], [1], [0, 0, 1, 1], [], []>} : vector<16x6xbf16>, vector<6x128xbf16>, vector<16x128xf32> -> vector<16x128xf32>
    %8 = arith.addf %5, %7 : vector<16x128xf32>
    %c0_11 = arith.constant 0 : index
    %c0_12 = arith.constant 0 : index
    %c0_13 = arith.constant 0 : index
    %9 = vector.load %arg5[%c0_11, %c0_12, %c0_13] : memref<1x1x128xf32, #tpu.memory_space<vmem>>, vector<1x1x128xf32>
    %10 = vector.shape_cast %9 : vector<1x1x128xf32> to vector<128xf32>
    %11 = vector.shape_cast %10 : vector<128xf32> to vector<1x128xf32>
    %12 = vector.broadcast %11 : vector<1x128xf32> to vector<16x128xf32>
    %13 = arith.addf %8, %12 : vector<16x128xf32>
    %cst_14 = arith.constant 0.000000e+00 : f32
    %14 = vector.broadcast %cst_14 : f32 to vector<16x128xf32>
    %15 = arith.cmpf ogt, %13, %14 : vector<16x128xf32>
    %cst_15 = arith.constant 0.00999999977 : f32
    %16 = vector.broadcast %cst_15 : f32 to vector<16x128xf32>
    %17 = arith.mulf %16, %13 : vector<16x128xf32>
    %18 = arith.select %15, %13, %17 : vector<16x128xi1>, vector<16x128xf32>
    %19 = arith.truncf %18 : vector<16x128xf32> to vector<16x128xbf16>
    %c0_16 = arith.constant 0 : index
    %c0_17 = arith.constant 0 : index
    %c0_18 = arith.constant 0 : index
    %20 = vector.load %arg8[%c0_16, %c0_17, %c0_18] : memref<1x128x128xbf16, #tpu.memory_space<vmem>>, vector<1x128x128xbf16>
    %21 = vector.shape_cast %20 : vector<1x128x128xbf16> to vector<128x128xbf16>
    %cst_19 = arith.constant dense<0.000000e+00> : vector<16x128xf32>
    %22 = tpu.matmul %19, %21, %cst_19 {dimension_numbers = #tpu.dot_dimension_numbers<[1], [0], [0], [1], [0, 0, 1, 1], [], []>} : vector<16x128xbf16>, vector<128x128xbf16>, vector<16x128xf32> -> vector<16x128xf32>
    %c0_20 = arith.constant 0 : index
    %c0_21 = arith.constant 0 : index
    %c0_22 = arith.constant 0 : index
    %23 = vector.load %arg9[%c0_20, %c0_21, %c0_22] : memref<1x1x128xf32, #tpu.memory_space<vmem>>, vector<1x1x128xf32>
    %24 = vector.shape_cast %23 : vector<1x1x128xf32> to vector<128xf32>
    %25 = vector.shape_cast %24 : vector<128xf32> to vector<1x128xf32>
    %26 = vector.broadcast %25 : vector<1x128xf32> to vector<16x128xf32>
    %27 = arith.addf %22, %26 : vector<16x128xf32>
    %cst_23 = arith.constant 0.000000e+00 : f32
    %28 = vector.broadcast %cst_23 : f32 to vector<16x128xf32>
    %29 = arith.cmpf ogt, %27, %28 : vector<16x128xf32>
    %cst_24 = arith.constant 0.00999999977 : f32
    %30 = vector.broadcast %cst_24 : f32 to vector<16x128xf32>
    %31 = arith.mulf %30, %27 : vector<16x128xf32>
    %32 = arith.select %29, %27, %31 : vector<16x128xi1>, vector<16x128xf32>
    %c0_25 = arith.constant 0 : index
    %c0_26 = arith.constant 0 : index
    %c0_27 = arith.constant 0 : index
    %c0_28 = arith.constant 0 : index
    %33 = vector.load %arg12[%c0_25, %c0_26, %c0_27, %c0_28] : memref<1x1x16x128xf32, #tpu.memory_space<vmem>>, vector<1x1x16x128xf32>
    %34 = vector.shape_cast %33 : vector<1x1x16x128xf32> to vector<16x128xf32>
    %35 = vector.shape_cast %32 : vector<16x128xf32> to vector<1x1x16x128xf32>
    tpu.vector_store %arg12[%c0_25, %c0_26, %c0_27, %c0_28], %35 {strides = array<i32>} : memref<1x1x16x128xf32, #tpu.memory_space<vmem>>, vector<1x1x16x128xf32>,
    %36 = arith.truncf %32 : vector<16x128xf32> to vector<16x128xbf16>
    %c0_29 = arith.constant 0 : index
    %c0_30 = arith.constant 0 : index
    %37 = vector.load %arg10[%c0_29, %c0_30] : memref<128x128xbf16, #tpu.memory_space<vmem>>, vector<128x128xbf16>
    %cst_31 = arith.constant dense<0.000000e+00> : vector<16x128xf32>
    %38 = tpu.matmul %36, %37, %cst_31 {dimension_numbers = #tpu.dot_dimension_numbers<[1], [0], [0], [1], [0, 0, 1, 1], [], []>} : vector<16x128xbf16>, vector<128x128xbf16>, vector<16x128xf32> -> vector<16x128xf32>
    %c0_32 = arith.constant 0 : index
    %c0_33 = arith.constant 0 : index
    %c0_34 = arith.constant 0 : index
    %39 = vector.load %arg11[%c0_32, %c0_33, %c0_34] : memref<1x1x128xf32, #tpu.memory_space<vmem>>, vector<1x1x128xf32>
    %40 = vector.shape_cast %39 : vector<1x1x128xf32> to vector<128xf32>
    %41 = vector.shape_cast %40 : vector<128xf32> to vector<1x128xf32>
    %42 = vector.broadcast %41 : vector<1x128xf32> to vector<16x128xf32>
    %43 = arith.addf %38, %42 : vector<16x128xf32>
    %c0_35 = arith.constant 0 : index
    %c0_36 = arith.constant 0 : index
    %c0_37 = arith.constant 0 : index
    %c0_38 = arith.constant 0 : index
    %44 = vector.load %arg13[%c0_35, %c0_36, %c0_37, %c0_38] : memref<1x1x16x128xf32, #tpu.memory_space<vmem>>, vector<1x1x16x128xf32>
    %45 = vector.shape_cast %44 : vector<1x1x16x128xf32> to vector<16x128xf32>
    %46 = vector.shape_cast %43 : vector<16x128xf32> to vector<1x1x16x128xf32>
    tpu.vector_store %arg13[%c0_35, %c0_36, %c0_37, %c0_38], %46 {strides = array<i32>} : memref<1x1x16x128xf32, #tpu.memory_space<vmem>>, vector<1x1x16x128xf32>,
    return
  }
  func.func @transform_0(%arg0: i32, %arg1: i32, %arg2: i32) -> (i32, i32, i32) {
    %c0_i32 = arith.constant 0 : i32
    %c0_i32_0 = arith.constant 0 : i32
    return %arg0, %arg1, %c0_i32 : i32, i32, i32
  }
  func.func @transform_1(%arg0: i32, %arg1: i32, %arg2: i32) -> (i32, i32, i32, i32) {
    %c0_i32 = arith.constant 0 : i32
    %c0_i32_0 = arith.constant 0 : i32
    return %arg0, %arg2, %arg1, %c0_i32 : i32, i32, i32, i32
  }
  func.func @transform_2(%arg0: i32, %arg1: i32, %arg2: i32) -> (i32, i32, i32) {
    %c0_i32 = arith.constant 0 : i32
    %c0_i32_0 = arith.constant 0 : i32
    %c0_i32_1 = arith.constant 0 : i32
    return %arg2, %c0_i32, %c0_i32_0 : i32, i32, i32
  }
  func.func @transform_3(%arg0: i32, %arg1: i32, %arg2: i32) -> (i32, i32) {
    %c0_i32 = arith.constant 0 : i32
    %c0_i32_0 = arith.constant 0 : i32
    %c0_i32_1 = arith.constant 0 : i32
    return %c0_i32, %c0_i32_0 : i32, i32
  }
  func.func @transform_4(%arg0: i32, %arg1: i32, %arg2: i32) -> (i32, i32) {
    %c0_i32 = arith.constant 0 : i32
    %c0_i32_0 = arith.constant 0 : i32
    %c0_i32_1 = arith.constant 0 : i32
    return %c0_i32, %c0_i32_0 : i32, i32
  }
  func.func @transform_5(%arg0: i32, %arg1: i32, %arg2: i32) -> (i32, i32, i32) {
    %c0_i32 = arith.constant 0 : i32
    %c0_i32_0 = arith.constant 0 : i32
    %c0_i32_1 = arith.constant 0 : i32
    %c0_i32_2 = arith.constant 0 : i32
    return %c0_i32, %c0_i32_0, %c0_i32_1 : i32, i32, i32
  }
  func.func @transform_6(%arg0: i32, %arg1: i32, %arg2: i32) -> (i32, i32, i32) {
    %c0_i32 = arith.constant 0 : i32
    %c0_i32_0 = arith.constant 0 : i32
    %c0_i32_1 = arith.constant 0 : i32
    %c0_i32_2 = arith.constant 0 : i32
    return %c0_i32, %c0_i32_0, %c0_i32_1 : i32, i32, i32
  }
  func.func @transform_7(%arg0: i32, %arg1: i32, %arg2: i32) -> (i32, i32) {
    %c0_i32 = arith.constant 0 : i32
    %c0_i32_0 = arith.constant 0 : i32
    %c0_i32_1 = arith.constant 0 : i32
    return %c0_i32, %c0_i32_0 : i32, i32
  }
  func.func @transform_8(%arg0: i32, %arg1: i32, %arg2: i32) -> (i32, i32, i32) {
    %c0_i32 = arith.constant 0 : i32
    %c0_i32_0 = arith.constant 0 : i32
    %c0_i32_1 = arith.constant 0 : i32
    %c0_i32_2 = arith.constant 0 : i32
    return %c0_i32, %c0_i32_0, %c0_i32_1 : i32, i32, i32
  }
  func.func @transform_9(%arg0: i32, %arg1: i32, %arg2: i32) -> (i32, i32, i32, i32) {
    %c0_i32 = arith.constant 0 : i32
    %c0_i32_0 = arith.constant 0 : i32
    return %arg0, %arg2, %arg1, %c0_i32 : i32, i32, i32, i32
  }
  func.func @transform_10(%arg0: i32, %arg1: i32, %arg2: i32) -> (i32, i32, i32, i32) {
    %c0_i32 = arith.constant 0 : i32
    %c0_i32_0 = arith.constant 0 : i32
    return %arg0, %arg2, %arg1, %c0_i32 : i32, i32, i32, i32
  }
}

</mosaic_0001>

<bundles_post_ra>
// kernel: tpu_custom_call.1
= control target key start
LH: loop header
LB: loop body
LE: loop exit
PB: predicated region body
PF: predicated region fallthrough
CT: control target
= control target key end

     0   :  { %s1823_s0 = inlined_call_operand.vmem [shape: bf16[2,16,13], index: 0, kind: input, shape index: {}]   ;;  %s1824_s1 = inlined_call_operand.vmem [shape: bf16[2,2,16,6], index: 1, kind: input, shape index: {}]   ;;  %s1825_s2 = inlined_call_operand.vmem [shape: f32[2,1,128], index: 2, kind: input, shape index: {}]   ;;  %s1826_s3 = inlined_call_operand.vmem [shape: bf16[13,128], index: 3, kind: input, shape index: {}]   ;;  %s1827_s4 = inlined_call_operand.vmem [shape: bf16[6,128], index: 4, kind: input, shape index: {}]   ;;  %s1828_s5 = inlined_call_operand.vmem [shape: bf16[1,128,128], index: 5, kind: input, shape index: {}]   ;;  %s1829_s6 = inlined_call_operand.vmem [shape: f32[1,1,128], index: 6, kind: input, shape index: {}]   ;;  %s1830_s7 = inlined_call_operand.hbm [shape: bf16[128,128], index: 7, kind: input, shape index: {}]   ;;  %s1831_s8 = inlined_call_operand.vmem [shape: f32[1,1,128], index: 8, kind: input, shape index: {}]   ;;  %s1832_s9 = inlined_call_operand.hbm [shape: f32[2,2,16,128], index: 9, kind: output, shape index: {0}]   ;;  %s1833_s10 = inlined_call_operand.hbm [shape: f32[2,2,16,128], index: 10, kind: output, shape index: {1}]  }
   0x1   :  { %1841 = sst [smem:[#allocation19_spill]] %s1830_s7 }
   0x2   :  { %16 = vsyncpa [#allocation3], 0 }
   0x3   :  { %17 = vsyncpa [#allocation4], 0 }
   0x4   :  { %19 = vsyncpa [#allocation4 + $0x1], 0 }
   0x5   :  { %20 = vsyncpa [#allocation7], 0 }
   0x6   :  { %22 = vsyncpa [#allocation7 + $0x1], 0  ;;  %s1535_s13 = smov 0   ;;  %s1537_s14 = smov 0  }
   0x7   :  { %s1539_s15 = smov 0   ;;  %s1541_s16 = smov 0  }
   0x8   :  { %s1543_s17 = smov 0   ;;  %s1545_s18 = smov 0  }
   0x9   :  { %s1547_s19 = smov 0   ;;  %s1549_s20 = smov 0  }
   0xa LB: > { %1842 = sst [smem:[#allocation11_spill]] %s1440_s13  ;;  %s1080_s21 = sadd.s32 4294967295, %s1468_s20   ;;  %s1468_s20 = sphi %s1549_s20, %s28_s20   ;;  %s1464_s19 = sphi %s1547_s19, %s1863_s19   ;;  %s1460_s18 = sphi %s1545_s18, %s1862_s18   ;;  %s1456_s17 = sphi %s1543_s17, %s1861_s17   ;;  %s1452_s16 = sphi %s1541_s16, %s1860_s16   ;;  %s1448_s15 = sphi %s1539_s15, %s1859_s15   ;;  %s1444_s14 = sphi %s1537_s14, %s1865_s14   ;;  %s1440_s13 = sphi %s1535_s13, %s1864_s13  }
   0xb   : > { %1843 = sst [smem:[#allocation12_spill]] %s1448_s15  ;;  %s1081_s22 = sadd.s32 4294967294, %s1468_s20  }
   0xc   : > { %1844 = sst [smem:[#allocation13_spill]] %s1460_s18  ;;  %s40_s23 = sadd.s32 1, %s1460_s18 }
   0xd   : > { %1845 = sst [smem:[#allocation14_spill]] %s1464_s19  ;;  %s47_s24 = sadd.s32 1, %s1464_s19 }
   0xe   : > { %p41_p0 = scmp.ge.s32.totalorder %s40_s23, 2  ;;  %s268_s25 = sadd.s32 1, %s1448_s15 }
   0xf   : > { %p278_p1 = scmp.ne.s32.totalorder %s1448_s15, %s1444_s14  ;;  %p279_p2 = scmp.eq.s32.totalorder %s1080_s21, 3 }
  0x10   : > { %s1867_s23 = smov (%p41_p0, %s40_s23), 0  ;;  %s1869_s24 = smov (!%p41_p0, %s47_s24), %s1464_s19 }
  0x11   : > { %1846 = sst [smem:[#allocation15_spill]] %s1867_s23  ;;  %s262_s26 = ssub.s32 %s1460_s18, %s1867_s23 }
  0x12   : > { %p1587_p3 = por %p279_p2, %p278_p1  ;;  %p49_p4 = scmp.ge.s32.totalorder %s1869_s24, 2 }
  0x13   : > { %p284_p5 = scmp.ne.s32.totalorder %s1444_s14, %s1440_s13  ;;  %p285_p6 = scmp.eq.s32.totalorder %s1081_s22, 3 }
  0x14   : > { %p1082_p7 = scmp.ge.s32.totalorder %s1468_s20, 1  ;;  %s1871_s24 = smov (%p49_p4, %s1869_s24), 0 }
  0x15   : > { %1848 = sst [smem:[#allocation16_spill]] %s1871_s24  ;;  %p1596_p8 = por %p285_p6, %p284_p5 }
  0x16   : > { %p322_p9 = scmp.lt.s32.totalorder %s1468_s20, 5  ;;  %s261_s29 = ssub.s32 %s1464_s19, %s1871_s24 }
  0x17   : > { %s1849_s28 = scalar_select %p1596_p8, 1, 0 }
  0x18   : > { %s263_s30 = sor.u32 %s262_s26, %s261_s29  ;;  %p1603_p10 = pnand %p1082_p7, %p322_p9 }
  0x19   : > { %1850 = sst [smem:[#allocation17_spill]] %s1849_s28  ;;  %p266_p11 = scmp.eq.s32.totalorder %s263_s30, 0 }
  0x1a   : > { %p1607_p12 = scmp.eq.s32.totalorder %s1080_s21, 0  ;;  %p1211_p13 = pneg %p1603_p10 }
  0x1b   : > { %s1614_s22 = scalar_select %p266_p11, %s1448_s15, %s268_s25  }
  0x1c   : > { %s1470_s23 = smov [#allocation2]   ;;  %p1618_p0 = pnand %p1607_p12, %p1211_p13 }
  0x1d   : > { %1853 = sst [smem:[#allocation18_spill]] %s1614_s22  ;;  %s346_s18 = sshll.u32 %s1470_s23, 4  ;;  %s347_s18 = int_to_ptr.vmem [resolvable:$true] %s346_s18 }
  0x1e   : > { %p1318_p1 = pneg %p1618_p0  ;;  %s1327_s21 = scalar_lea.vmem %s347_s18, 1024 }
  0x1f   : > { %p1328_p2 = scmp.ne.s32.totalorder %s347_s18, %s1327_s21  ;;  %p1335_p6 = scmp.lt.s32.totalorder %s347_s18, %s347_s18 }
  0x20   : > { %p1336_p7 = scmp.lt.s32.totalorder %s1327_s21, %s1327_s21 }
  0x21   : > { %p1330_p4 = pnand %p1328_p2, %p1318_p1 }
  0x22   : > { %p1337_p9 = por %p1336_p7, %p1335_p6 }
  0x23   : > { %p1331_p5 = pneg %p1330_p4 }
  0x25   : > { %p1338_p11 = pnand %p1337_p9, %p1331_p5 }
  0x27   : > { %1341 = shalt.err (!%p1338_p11)
}
  0x28   : > { %s1471_s25 = smov 64   ;;  %s1472_s23 = smov 4  }
  0x29   : > { %s1855_s7 = sld [smem:[#allocation19_spill]] }
  0x2b   : > { %401 = sbr.rel (%p1603_p10) target bundleno = 681 (0x2a9), region = 56 }
  0x2f   : > { %1214 = dma.hbm_to_vmem [thread:$0]  (!%p1618_p0), %s1855_s7, 1024, %s347_s18, [#allocation3], %s1471_s25, %s1471_s25, %s1472_s23  }
  0x30   : > { %1427 = dma.done.wait (%p1607_p12), [#allocation3], 1024  }
  0x31   : > { %1429 = vsyncadd (%p1607_p12), [#allocation3], 4294966272  ;;  %p465_p13 = scmp.lt.s32.totalorder %s1456_s17, 1  ;;  %v1473_v0 = vmov 0.0   ;;  %vm1474_vm0 = vmmov 0   ;;  %p477_p0 = scmp.lt.s32.totalorder %s1452_s16, 1 }
  0x32   : > { %1151 = vmatprep.subr.bf16.mxu0 %v1473_v0  ;;  %1153 = vmatprep.mubr.msk.bf16.mxu0 %vm1474_vm0, %v1473_v0  ;;  %vm569_vm1 = vcmask 1045504   ;;  %vm570_vm2 = vcmask 1046528   ;;  %v1475_v1 = vmov 65535   ;;  %vm510_vm3 = vcmask 1042432   ;;  %v500_v3 = vld [vmem:[%s1827_s4] sm:$0x7] }
  0x33   : > { %1157 = vmatprep.subr.bf16.mxu1 %v1473_v0  ;;  %s466_s18 = scalar_select %p465_p13, %s1456_s17, 1  ;;  %1159 = vmatprep.mubr.msk.bf16.mxu1 %vm1474_vm0, %v1473_v0  ;;  %v571_v2 = vsel %vm569_vm1, 4294967295, %v1475_v1  ;;  %v512_v5 = vsel %vm510_vm3, %v500_v3, 0  ;;  %v1298_v6 = vld [vmem:[%s1826_s3] sm:$0x7f]   ;;  %v1300_v7 = vld [vmem:[%s1828_s5 + $0x38] sm:$0xff]  }
  0x34   : > { %s1645_s11 = scalar_select %p477_p0, %s1452_s16, 1  ;;  %v572_v4 = vsel %vm570_vm2, %v571_v2, 0  ;;  %1152 = vmatpush3.bf16.msra.mxu0 %v512_v5  ;;  %vm506_vm4 = vcmask 48128   ;;  %vm565_vm5 = vcmask 105472   ;;  %v1301_v11 = vld [vmem:[%s1828_s5 + $0x30] sm:$0xff]   ;;  %v1302_v12 = vld [vmem:[%s1828_s5 + $0x28] sm:$0xff]  }
  0x35   : > { %s1092_s12 = sshll.u32 %s466_s18, 2  ;;  %s1128_s26 = sshll.u32 %s466_s18, 3  ;;  %v574_v10 = vand.u32 %v1298_v6, %v572_v4  ;;  %1163 = vmatprep.subr.bf16.mxu0 %v1473_v0  ;;  %v1303_v13 = vld [vmem:[%s1828_s5 + $0x20] sm:$0xff]   ;;  %v1304_v14 = vld [vmem:[%s1828_s5 + $0x18] sm:$0xff]   ;;  %v1305_v15 = vld [vmem:[%s1828_s5 + $0x10] sm:$0xff]  }
  0x36   : > { %s1091_s21 = sshll.u32 %s1645_s11, 1  ;;  %s472_s30 = scalar_lea.vmem %s1823_s0, %s1128_s26  ;;  %v1306_v16 = vld [vmem:[%s1828_s5 + $0x8] sm:$0xff]   ;;  %v1307_v17 = vld [vmem:[%s1828_s5] sm:$0xff]   ;;  %v1308_v18 = vld [vmem:[#allocation2 + $0x38] sm:$0xff]  }
  0x37   : > { %s484_s25 = sadd.s32 %s1092_s12, %s1091_s21  ;;  %v1299_v9 = vld [vmem:[%s472_s30] sm:$0xff]   ;;  %1158 = vmatpush3.bf16.msra.mxu1 %v574_v10  ;;  %v1309_v19 = vld [vmem:[#allocation2 + $0x30] sm:$0xff]   ;;  %v1310_v20 = vld [vmem:[#allocation2 + $0x28] sm:$0xff]   ;;  %s490_s15 = scalar_lea.vmem %s1825_s2, %s1645_s11 }
  0x38   : > { %s1093_s19 = sshll.u32 %s484_s25, 2  ;;  %1183 = vmatprep.subr.bf16.mxu1 %v1473_v0  ;;  %v1311_v21 = vld [vmem:[#allocation2 + $0x20] sm:$0xff]   ;;  %v1312_v22 = vld [vmem:[#allocation2 + $0x18] sm:$0xff]   ;;  %v1313_v41 = vld [vmem:[#allocation2 + $0x10] sm:$0xff]   ;;  %s1709_s11 = sand.u32 1, %s1444_s14  }
  0x39   : > { %s486_s28 = scalar_lea.vmem %s1824_s1, %s1093_s19  ;;  %v1099_v26 = vld [vmem:[%s490_s15] ss:$0 sm:$0xff]  ;;  %v1314_v42 = vld [vmem:[#allocation2 + $0x8] sm:$0xff]   ;;  %s1087_s24 = sshll.u32 %s1709_s11, 4 }
  0x3a   : > { %v1297_v8 = vld [vmem:[%s486_s28] sm:$0xff]   ;;  %1160 = vmatmul.mubr.msk.bf16.vlgmr.msra.gmra.mxu1 %vm565_vm5, %v1299_v9  ;;  %s456_s28 = scalar_lea.vmem [#allocation5], %s1087_s24  ;;  %s1120_s26 = sshll.u32 %s1452_s16, 1 }
  0x3b   : > { %1154 = vmatmul.mubr.msk.bf16.vlgmr.msra.gmra.mxu0 %vm506_vm4, %v1297_v8  ;;  %1199 = vmatprep.mubr.msk.bf16.mxu1 %vm1474_vm0, %v1473_v0  ;;  %v1315_v43 = vld [vmem:[#allocation2] sm:$0xff]   ;;  %s891_s22 = sshll.u32 %s456_s28, 4  ;;  %s1121_s25 = sshll.u32 %s1456_s17, 2  ;;  %s1719_s22 = int_to_ptr.vmem [resolvable:$true] %s891_s22 }
  0x3c   : > { %1164 = vmatpush3.bf16.msra.mxu0 %v1300_v7  ;;  %1179 = vmatprep.mubr.msk.bf16.mxu0 %vm1474_vm0, %v1473_v0  ;;  %v1100_v44 = vld [vmem:[%s1829_s6] ss:$0 sm:$0xff]  ;;  %s1721_s23 = sadd.s32 %s1121_s25, %s1120_s26  ;;  %s869_s21 = scalar_lea.sflag [#allocation4], %s1709_s11 }
  0x3d   : > { %1165 = vmatprep.subr.bf16.mxu0 %v1473_v0  ;;  %1184 = vmatpush3.bf16.msra.mxu1 %v1308_v18  ;;  %s1122_s29 = sshll.u32 %s1721_s23, 7  ;;  %s1342_s7 = scalar_lea.vmem %s1719_s22, 256 }
  0x3e   : > { %1185 = vmatprep.subr.bf16.mxu1 %v1473_v0  ;;  %s1729_s12 = scalar_lea.hbm %s1832_s9, %s1122_s29  ;;  %p1343_p10 = scmp.ne.s32.totalorder %s1719_s22, %s1342_s7 }
  0x3f   : > { %s1476_s16 = smov [#allocation5]  }
  0x40   : > { %1166 = vmatpush3.bf16.msra.mxu0 %v1301_v11  ;;  %p1344_p12 = pnand %p1343_p10, %p1587_p3  ;;  %s1346_s17 = sshll.u32 %s1476_s16, 4  ;;  %s1347_s17 = int_to_ptr.vmem [resolvable:$false] %s1346_s17 }
  0x41   : > { %1167 = vmatprep.subr.bf16.mxu0 %v1473_v0  ;;  %1186 = vmatpush3.bf16.msra.mxu1 %v1309_v19  ;;  %s1348_s15 = scalar_lea.vmem %s1347_s17, 512  ;;  %p1349_p2 = scmp.lt.s32.totalorder %s1719_s22, %s1347_s17 }
  0x42   : > { %1187 = vmatprep.subr.bf16.mxu1 %v1473_v0  ;;  %p1345_p1 = pneg %p1344_p12  ;;  %p1350_p4 = scmp.lt.s32.totalorder %s1348_s15, %s1342_s7 }
  0x44   : > { %1168 = vmatpush3.bf16.msra.mxu0 %v1302_v12  ;;  %p1351_p5 = por %p1350_p4, %p1349_p2 }
  0x45   : > { %1169 = vmatprep.subr.bf16.mxu0 %v1473_v0  ;;  %1188 = vmatpush3.bf16.msra.mxu1 %v1310_v20 }
  0x46   : > { %1189 = vmatprep.subr.bf16.mxu1 %v1473_v0  ;;  %p1352_p6 = pnand %p1351_p5, %p1345_p1 }
  0x48   : > { %1170 = vmatpush3.bf16.msra.mxu0 %v1303_v13 }
  0x49   : > { %1171 = vmatprep.subr.bf16.mxu0 %v1473_v0  ;;  %1190 = vmatpush3.bf16.msra.mxu1 %v1311_v21 }
  0x4a   : > { %1191 = vmatprep.subr.bf16.mxu1 %v1473_v0 }
  0x4c   : > { %1172 = vmatpush3.bf16.msra.mxu0 %v1304_v14 }
  0x4d   : > { %1173 = vmatprep.subr.bf16.mxu0 %v1473_v0  ;;  %1192 = vmatpush3.bf16.msra.mxu1 %v1312_v22 }
  0x4e   : > { %1193 = vmatprep.subr.bf16.mxu1 %v1473_v0 }
  0x50   : > { %1174 = vmatpush3.bf16.msra.mxu0 %v1305_v15 }
  0x51   : > { %1175 = vmatprep.subr.bf16.mxu0 %v1473_v0  ;;  %1194 = vmatpush3.bf16.msra.mxu1 %v1313_v41 }
  0x52   : > { %1195 = vmatprep.subr.bf16.mxu1 %v1473_v0 }
  0x54   : > { %1176 = vmatpush3.bf16.msra.mxu0 %v1306_v16 }
  0x55   : > { %1177 = vmatprep.subr.bf16.mxu0 %v1473_v0  ;;  %1196 = vmatpush3.bf16.msra.mxu1 %v1314_v42 }
  0x56   : > { %1197 = vmatprep.subr.bf16.mxu1 %v1473_v0 }
  0x58   : > { %1178 = vmatpush3.bf16.msra.mxu0 %v1307_v17 }
  0x59   : > { %1198 = vmatpush3.bf16.msra.mxu1 %v1315_v43 }
  0xfa   : > { %v610_v25 = vpop.f32.mrf.mxu1 }
  0xfb   : > { %v548_v23 = vpop.f32.mrf.mxu0 }
  0xfc   : > { %v611_v27 = vadd.f32 %v610_v25, %v548_v23  ;;  %v1161_v29 = vpop.f32.mrf.mxu1 }
  0xfd   : > { %v1155_v24 = vpop.f32.mrf.mxu0 }
  0xfe   : > { %v624_v30 = vadd.f32 %v1099_v26, %v611_v27  ;;  %v613_v32 = vpop.f32.mrf.mxu1 }
  0xff   : > { %v551_v28 = vpop.f32.mrf.mxu0 }
 0x100   : > { %v614_v33 = vadd.f32 %v613_v32, %v551_v28  ;;  %v1162_v34 = vpop.f32.mrf.mxu1  ;;  %v628_v35 = vmul.f32 0.01, %v624_v30  ;;  %vm626_vm6 = vcmp.gt.f32.partialorder %v624_v30, 0.0 }
 0x101   : > { %v1156_v31 = vpop.f32.mrf.mxu0 }
 0x102   : > { %v625_v36 = vadd.f32 %v1099_v26, %v614_v33  ;;  %v630_v38 = vsel %vm626_vm6, %v624_v30, %v628_v35 }
 0x104   : > { %vm627_vm7 = vcmp.gt.f32.partialorder %v625_v36, 0.0  ;;  %v629_v37 = vmul.f32 0.01, %v625_v36 }
 0x106   : > { %v631_v39 = vsel %vm627_vm7, %v625_v36, %v629_v37 }
 0x107   : > { %v632_v40 = vpack.c.bf16 %v631_v39, %v630_v38 }
 0x109   : > { %1180 = vmatmul.mubr.bf16.vlgmr.msra.gmra.mxu0 %v632_v40 }
 0x1c9   : > { %v738_v45 = vpop.f32.mrf.mxu0 }
 0x1ca   : > { %v739_v46 = vadd.f32 %v1100_v44, %v738_v45 }
 0x1cb   : > { %v1181_v47 = vpop.f32.mrf.mxu0 }
 0x1cc   : > { %vm745_vm8 = vcmp.gt.f32.partialorder %v739_v46, 0.0  ;;  %v747_v48 = vmul.f32 0.01, %v739_v46 }
 0x1cd   : > { %v741_v49 = vpop.f32.mrf.mxu0 }
 0x1ce   : > { %v749_v50 = vsel %vm745_vm8, %v739_v46, %v747_v48  ;;  %v742_v51 = vadd.f32 %v1100_v44, %v741_v49 }
 0x1cf   : > { %751 = vst [vmem:[%s456_s28] sm:$0xff] %v749_v50  ;;  %v1182_v52 = vpop.f32.mrf.mxu0 }
 0x1d0   : > { %vm746_vm9 = vcmp.gt.f32.partialorder %v742_v51, 0.0  ;;  %v748_v53 = vmul.f32 0.01, %v742_v51 }
 0x1d2   : > { %v750_v54 = vsel %vm746_vm9, %v742_v51, %v748_v53 }
 0x1d3   : > { %752 = vst [vmem:[%s456_s28 + $0x8] sm:$0xff] %v750_v54  ;;  %v753_v55 = vpack.c.bf16 %v750_v54, %v749_v50 }
 0x1d5   : > { %1200 = vmatmul.mubr.bf16.vlgmr.msra.gmra.mxu1 %v753_v55 }
 0x1d6   : > { %1355 = shalt.err (!%p1352_p6)
}
 0x1d7   : > { %s1356_s13 = scalar_lea.hbm %s1729_s12, 256  ;;  %s1360_s26 = scalar_lea.hbm %s1832_s9, 1024 }
 0x1d8   : > { %p1357_p7 = scmp.ne.s32.totalorder %s1729_s12, %s1356_s13  ;;  %p1361_p13 = scmp.lt.s32.totalorder %s1729_s12, %s1832_s9 }
 0x1d9   : > { %p1362_p0 = scmp.lt.s32.totalorder %s1360_s26, %s1356_s13 }
 0x1da   : > { %p1358_p9 = pnand %p1357_p7, %p1587_p3 }
 0x1db   : > { %p1363_p10 = por %p1362_p0, %p1361_p13 }
 0x1dc   : > { %p1359_p11 = pneg %p1358_p9 }
 0x1de   : > { %p1364_p12 = pnand %p1363_p10, %p1359_p11 }
 0x1e0   : > { %1367 = shalt.err (!%p1364_p12)
}
 0x1e1   : > { %s1477_s18 = smov 128   ;;  %s1478_s7 = smov 8   ;;  %v1109_v56 = vld [vmem:[%s1831_s8] ss:$0 sm:$0xff] }
 0x1e2   : > { %1207 = dma.vmem_to_hbm [thread:$0]  (%p1587_p3), %s1719_s22, 256, %s1729_s12, %s869_s21, %s1477_s18, %s1477_s18, %s1478_s7  }
 0x1e3   : > { %s463_s15 = scalar_lea.vmem [#allocation6], %s1087_s24  ;;  %s1769_s21 = scalar_lea.hbm %s1833_s10, %s1122_s29 }
 0x1e4   : > { %s911_s13 = sshll.u32 %s463_s15, 4  ;;  %s874_s19 = scalar_lea.sflag [#allocation7], %s1709_s11  ;;  %s1762_s13 = int_to_ptr.vmem [resolvable:$true] %s911_s13 }
 0x1e5   : > { %s1368_s24 = scalar_lea.vmem %s1762_s13, 256  ;;  %s1479_s28 = smov [#allocation6]  }
 0x1e6   : > { %p1369_p1 = scmp.ne.s32.totalorder %s1762_s13, %s1368_s24  ;;  %s1372_s26 = sshll.u32 %s1479_s28, 4  ;;  %s1373_s26 = int_to_ptr.vmem [resolvable:$false] %s1372_s26 }
 0x1e7   : > { %s1374_s25 = scalar_lea.vmem %s1373_s26, 512  ;;  %p1375_p5 = scmp.lt.s32.totalorder %s1762_s13, %s1373_s26 }
 0x1e8   : > { %p1370_p2 = pnand %p1369_p1, %p1587_p3  ;;  %p1376_p6 = scmp.lt.s32.totalorder %s1374_s25, %s1368_s24 }
 0x1ea   : > { %p1371_p4 = pneg %p1370_p2  ;;  %p1377_p7 = por %p1376_p6, %p1375_p5 }
 0x1ec   : > { %p1378_p9 = pnand %p1377_p7, %p1371_p4 }
 0x295   : > { %v859_v57 = vpop.f32.mrf.mxu1 }
 0x296   : > { %v860_v58 = vadd.f32 %v1109_v56, %v859_v57 }
 0x297   : > { %v1201_v59 = vpop.f32.mrf.mxu1 }
 0x298   : > { %866 = vst [vmem:[%s463_s15] sm:$0xff] %v860_v58 }
 0x299   : > { %v862_v60 = vpop.f32.mrf.mxu1 }
 0x29a   : > { %v863_v61 = vadd.f32 %v1109_v56, %v862_v60 }
 0x29b   : > { %v1202_v62 = vpop.f32.mrf.mxu1 }
 0x29c   : > { %867 = vst [vmem:[%s463_s15 + $0x8] sm:$0xff] %v863_v61 }
 0x29d   : > { %1381 = shalt.err (!%p1378_p9)
}
 0x29e   : > { %s1382_s23 = scalar_lea.hbm %s1769_s21, 256  ;;  %s1386_s30 = scalar_lea.hbm %s1833_s10, 1024 }
 0x29f   : > { %p1383_p11 = scmp.ne.s32.totalorder %s1769_s21, %s1382_s23  ;;  %p1387_p10 = scmp.lt.s32.totalorder %s1769_s21, %s1833_s10 }
 0x2a0   : > { %p1388_p12 = scmp.lt.s32.totalorder %s1386_s30, %s1382_s23 }
 0x2a1   : > { %p1384_p13 = pnand %p1383_p11, %p1587_p3 }
 0x2a2   : > { %p1389_p1 = por %p1388_p12, %p1387_p10 }
 0x2a3   : > { %p1385_p0 = pneg %p1384_p13 }
 0x2a5   : > { %p1390_p2 = pnand %p1389_p1, %p1385_p0 }
 0x2a7   : > { %1393 = shalt.err (!%p1390_p2)
}
 0x2a8   : > { %1208 = dma.vmem_to_hbm [thread:$0]  (%p1587_p3), %s1762_s13, 256, %s1769_s21, %s874_s19, %s1477_s18, %s1477_s18, %s1478_s7  }
 0x2a9 PF: > { %s1856_s15 = sld [smem:[#allocation11_spill]]  ;;  %p1224_p4 = scmp.ge.s32.totalorder %s1468_s20, 2 }
 0x2ab   : > { %p1216_p5 = pnand %p1224_p4, %p1596_p8 }
 0x2ad   : > { %p1217_p6 = pneg %p1216_p5 }
 0x2af   : > { %s926_s12 = sand.u32 1, %s1856_s15  }
 0x2b0   : > { %s927_s24 = scalar_lea.sflag [#allocation4], %s926_s12 }
 0x2b1   : > { %1431 = dma.done.wait (%p1217_p6), %s927_s24, 256  }
 0x2b2   : > { %1433 = vsyncadd (%p1217_p6), %s927_s24, 4294967040  ;;  %s936_s28 = scalar_lea.sflag [#allocation7], %s926_s12 }
 0x2b3   : > { %1435 = dma.done.wait (%p1217_p6), %s936_s28, 256  }
 0x2b4   : > { %1437 = vsyncadd (%p1217_p6), %s936_s28, 4294967040  ;;  %s28_s20 = sadd.s32 1, %s1468_s20   ;;  %s1858_s27 = sld [smem:[#allocation12_spill]] }
 0x2b5   : > { %p25_p7 = scmp.ge.s32.totalorder %s28_s20, 6   ;;  %s1859_s15 = sld [smem:[#allocation18_spill]] }
 0x2b6   : > { %s1860_s16 = sld [smem:[#allocation13_spill]]  ;;  %s1864_s13 = smov %s1444_s14 }
 0x2b7   : > { %s1861_s17 = sld [smem:[#allocation14_spill]]  ;;  %27 = sbr.rel (!%p25_p7) target bundleno = 10 (0xa), region = 119 }
 0x2b8   : > { %s1862_s18 = sld [smem:[#allocation15_spill]] }
 0x2b9   : > { %s1863_s19 = sld [smem:[#allocation16_spill]] }
 0x2ba   : > { %s1865_s14 = smov %s1858_s27 }
 0x2bc   :  { %941 = vsyncpa [#allocation3], 1 }
 0x2bd   :  { %943 = vsyncpa [#allocation3 + $0x1], 1 }
 0x2be   :  { %944 = vsyncpa [#allocation4], 1 }
 0x2bf   :  { %946 = vsyncpa [#allocation4 + $0x1], 1 }
 0x2c0   :  { %947 = vsyncpa [#allocation7], 1 }
 0x2c1   :  { %949 = vsyncpa [#allocation7 + $0x1], 1 }

</bundles_post_ra>
